<compile_context>
chip_gen: v7x
topology: tpu7x:2x2x1
jax: 0.10.0
libtpu: 0.0.40
codegen_flags: <defaults>
</compile_context>

<pallas_src>
import functools

import jax
import jax.numpy as jnp
from jax import lax
from jax.experimental import pallas as pl
from jax.experimental.pallas import tpu as pltpu


def _jaccard_kernel(logits_ref, truth_ref, inter_ref, sum_ref, *,
                    hw, tn, tiles_per_shard, soft, apply_softmax, needs_mask):
    t = pl.program_id(2)

    @pl.when(t == 0)
    def _():
        inter_ref[...] = jnp.zeros_like(inter_ref)
        sum_ref[...] = jnp.zeros_like(sum_ref)

    logits = logits_ref[...].astype(jnp.float32)          # (C, TN)
    truth = truth_ref[...].astype(jnp.int32)              # (1, TN)
    C = logits.shape[0]

    # (C, 1) class-index column; folded into the broadcasting compares below
    # so a full (C, TN) iota is never materialized / regenerated per step.
    class_col = lax.broadcasted_iota(jnp.int32, (C, 1), 0)

    lane_valid = None
    if needs_mask:
        # Global pixel-tile position (un-clamped) so redundant tiles from an
        # uneven shard split mask to zero contribution.
        pos = pl.program_id(1) * tiles_per_shard + t
        rem = hw - pos * tn
        lane_valid = lax.broadcasted_iota(jnp.int32, (1, tn), 1) < rem
        truth = jnp.where(lane_valid, truth, -1)           # class -1: no match

    truth_oh = (truth == class_col).astype(jnp.float32)    # (C, TN)

    if not soft:
        # argmax over the class (sublane) axis; softmax is strictly monotone
        # per pixel so it is skipped entirely.  Lowest-index tie-break
        # (matches jnp.argmax / torch.argmax's lowest-index convention).
        max_p = jnp.max(logits, axis=0, keepdims=True)                 # (1, TN)
        pred_idx = jnp.min(jnp.where(logits == max_p, class_col, C),
                           axis=0, keepdims=True)                      # (1, TN)
        if needs_mask:
            pred_idx = jnp.where(lane_valid, pred_idx, C)
        pred = (pred_idx == class_col).astype(jnp.float32)             # (C, TN)
    else:
        if apply_softmax:
            x = jnp.where(lane_valid, logits, 0.0) if needs_mask else logits
            m = jnp.max(x, axis=0, keepdims=True)
            e = jnp.exp(x - m)
            denom = jnp.sum(e, axis=0, keepdims=True)
            r = pl.reciprocal(denom, approx=True)
            r = r * (2.0 - denom * r)       # one Newton step -> ~f32-exact
            pred = e * r
        else:
            pred = logits
        if needs_mask:
            pred = jnp.where(lane_valid, pred, 0.0)

    # Two cross-lane reductions per step: intersection + fused (pred + truth).
    inter_ref[...] += jnp.sum(pred * truth_oh, axis=1, keepdims=True)
    sum_ref[...] += jnp.sum(pred + truth_oh, axis=1, keepdims=True)


def _pick_tile(hw, n_classes, max_lanes):
    """Largest pixel tile (lanes) under a generation-safe VMEM/vreg budget."""
    # Keep the per-step f32 working set (C * tn elements) around ~2 MiB: big
    # enough to amortize the ~0.35 us grid-step overhead and keep DMAs large,
    # small enough that the double-buffered blocks plus (C, tn) intermediates
    # stay well inside v7x's 64 MiB VMEM per TensorCore.
    budget_elems = 512 * 1024
    tn_max = max(128, (budget_elems // max(n_classes, 1)) // 128 * 128)
    tn_max = min(tn_max, 128 * 1024)
    if max_lanes is not None:
        tn_max = min(tn_max, max(128, max_lanes // 128 * 128))
    if hw <= tn_max:
        return hw                       # single full-extent tile (no masking)
    if hw % 128 == 0:
        # Prefer a 128-multiple divisor => tail masking compiled out.
        for cand in range(tn_max, tn_max // 2, -128):
            if hw % cand == 0:
                return cand
    return tn_max                       # masked (partial) last tile


def jaccard_index(inputs, truth, *, soft=False, apply_softmax=True,
                  skip_first_class=True, smooth=1e-7, label_dtype=None,
                  max_lanes=None):
    """JAX/Pallas equivalent of JaccardIndex.forward(inputs, truth).

    inputs: (B, C, H, W) logits (f32 or bf16 -- streamed from HBM as-is).
    truth:  (B, H, W) integer class labels.
    label_dtype: optionally narrow the label stream (e.g. jnp.int8 for
        C <= 127) to cut label HBM traffic on bandwidth-bound v5e/v6e.
    max_lanes: manual override / test hook for the pixel tile size.
    """
    B, C, H, W = inputs.shape
    HW = H * W

    logits = inputs.reshape(B, C, HW)              # contiguous, no HBM copy
    labels = truth.reshape(B, 1, HW)
    if label_dtype is not None:
        labels = labels.astype(label_dtype)
    elif labels.dtype != jnp.int32:
        labels = labels.astype(jnp.int32)

    tn = _pick_tile(HW, C, max_lanes)
    num_tiles = pl.cdiv(HW, tn)
    needs_mask = (HW % tn) != 0

    # Two pixel shards (both marked "parallel") keep both v7x TensorCores busy
    # even when B == 1; the wrapper sums the per-shard partials with B.
    num_shards = 2 if num_tiles >= 2 else 1
    tiles_per_shard = pl.cdiv(num_tiles, num_shards)
    padded = num_shards * tiles_per_shard != num_tiles
    if padded:
        needs_mask = True               # redundant trailing tile, fully masked

    def pix(s, t):
        pos = s * tiles_per_shard + t
        if padded:
            pos = jnp.minimum(pos, num_tiles - 1)   # keep the DMA in-bounds
        return pos

    kernel = functools.partial(
        _jaccard_kernel, hw=HW, tn=tn, tiles_per_shard=tiles_per_shard,
        soft=soft, apply_softmax=apply_softmax, needs_mask=needs_mask)

    inter_acc, sum_acc = pl.pallas_call(
        kernel,
        out_shape=(jax.ShapeDtypeStruct((B, num_shards, C, 1), jnp.float32),
                   jax.ShapeDtypeStruct((B, num_shards, C, 1), jnp.float32)),
        grid=(B, num_shards, tiles_per_shard),
        in_specs=[pl.BlockSpec((None, C, tn), lambda b, s, t: (b, 0, pix(s, t))),
                  pl.BlockSpec((None, 1, tn), lambda b, s, t: (b, 0, pix(s, t)))],
        out_specs=(pl.BlockSpec((None, None, C, 1), lambda b, s, t: (b, s, 0, 0)),
                   pl.BlockSpec((None, None, C, 1), lambda b, s, t: (b, s, 0, 0))),
        compiler_params=pltpu.CompilerParams(
            dimension_semantics=("parallel", "parallel", "arbitrary"),
            vmem_limit_bytes=32 * 1024 * 1024),
    )(logits, labels)

    start_c = 1 if skip_first_class else 0
    inter = jnp.sum(inter_acc[:, :, start_c:, 0], axis=(0, 1))   # (C - start,)
    both = jnp.sum(sum_acc[:, :, start_c:, 0], axis=(0, 1))      # pred + truth
    union = both - inter
    return jnp.mean(inter / (union + jnp.float32(smooth)))


def _jaccard_ref(inputs, truth, *, n_classes, soft=False, apply_softmax=True,
                 skip_first_class=True, smooth=1e-7):
    """Pure-JAX replica of the PyTorch forward for verification."""
    def one_hot(x):
        oh = jax.nn.one_hot(x, n_classes, axis=-1)       # (B, H, W, C)
        oh = jnp.transpose(oh, (0, 3, 1, 2))              # (B, C, H, W)
        if skip_first_class:
            oh = oh[:, 1:, :, :]
        return oh

    t = one_hot(truth)
    x = inputs
    if apply_softmax:
        x = jax.nn.softmax(x, axis=1)
    if not soft:
        x = one_hot(jnp.argmax(x, axis=1))
    elif skip_first_class:
        x = x[:, 1:, :, :]
    inter = jnp.sum(x * t, axis=(0, 2, 3))
    union = jnp.sum(x + t, axis=(0, 2, 3)) - inter
    return jnp.mean(inter / (union + smooth))


if __name__ == "__main__":
    B, C, H, W = 2, 4, 16, 16
    key = jax.random.PRNGKey(0)
    k1, k2, k3, k4 = jax.random.split(key, 4)
    inputs = jax.random.normal(k1, (B, C, H, W), dtype=jnp.float32)
    truth = jax.random.randint(k2, (B, H, W), 0, C, dtype=jnp.int32)

    # hard IoU (default config) -- exact path, single full-extent tile
    iou = jax.block_until_ready(jaccard_index(inputs, truth))
    ref = _jaccard_ref(inputs, truth, n_classes=C)
    assert jnp.allclose(iou, ref, atol=1e-5, rtol=1e-5), (iou, ref)

    # forced multi-tile path -> exercises the 2-shard "parallel" axis
    iou_t = jax.block_until_ready(jaccard_index(inputs, truth, max_lanes=128))
    assert jnp.allclose(iou_t, ref, atol=1e-5, rtol=1e-5), (iou_t, ref)

    # ragged pixel count -> tail masking + clamped redundant shard tile
    inputs_r = jax.random.normal(k3, (B, C, 18, 18), dtype=jnp.float32)
    truth_r = jax.random.randint(k4, (B, 18, 18), 0, C, dtype=jnp.int32)
    iou_r = jax.block_until_ready(jaccard_index(inputs_r, truth_r,
                                                max_lanes=128))
    ref_r = _jaccard_ref(inputs_r, truth_r, n_classes=C)
    assert jnp.allclose(iou_r, ref_r, atol=1e-5, rtol=1e-5), (iou_r, ref_r)

    # soft IoU (EUP reciprocal + one Newton step in-kernel)
    iou_s = jax.block_until_ready(jaccard_index(inputs, truth, soft=True))
    ref_s = _jaccard_ref(inputs, truth, n_classes=C, soft=True)
    assert jnp.allclose(iou_s, ref_s, atol=1e-3, rtol=1e-3), (iou_s, ref_s)

    # bf16 logits stream from HBM without an upcast (hard path stays exact)
    inputs_bf = inputs.astype(jnp.bfloat16)
    iou_b = jax.block_until_ready(jaccard_index(inputs_bf, truth))
    ref_b = _jaccard_ref(inputs_bf.astype(jnp.float32), truth, n_classes=C)
    assert jnp.allclose(iou_b, ref_b, atol=1e-5, rtol=1e-5), (iou_b, ref_b)

    print("KERNEL_OK")
</pallas_src>

<mosaic_0001>
module attributes {stable_mosaic.version = 11 : i64} {
  func.func @_jaccard_kernel(%arg0: i32, %arg1: i32, %arg2: i32, %arg3: memref<1x4x256xf32, #tpu.memory_space<vmem>>, %arg4: memref<1x1x256xi32, #tpu.memory_space<vmem>>, %arg5: memref<1x1x4x1xf32, #tpu.memory_space<vmem>>, %arg6: memref<1x1x4x1xf32, #tpu.memory_space<vmem>>) attributes {dimension_semantics = [#tpu.dimension_semantics<parallel>, #tpu.dimension_semantics<parallel>, #tpu.dimension_semantics<arbitrary>], iteration_bounds = array<i64: 2, 1, 1>, scalar_prefetch = 0 : i64, scratch_operands = 0 : i64, tpu.core_type = #tpu.core_type<tc>, window_params = [{transform_indices = @transform_0, window_bounds = array<i64: 1, 4, 256>}, {transform_indices = @transform_1, window_bounds = array<i64: 1, 1, 256>}, {transform_indices = @transform_2, window_bounds = array<i64: 1, 1, 4, 1>}, {transform_indices = @transform_3, window_bounds = array<i64: 1, 1, 4, 1>}]} {
    %c0_i32 = arith.constant 0 : i32
    %0 = arith.cmpi eq, %arg2, %c0_i32 : i32
    %1 = arith.extui %0 : i1 to i32
    %c0_i32_0 = arith.constant 0 : i32
    %2 = arith.cmpi ne, %1, %c0_i32_0 : i32
    scf.if %2 {
      %cst_25 = arith.constant 0.000000e+00 : f32
      %46 = vector.broadcast %cst_25 : f32 to vector<4x1xf32>
      %c0_26 = arith.constant 0 : index
      %c0_27 = arith.constant 0 : index
      %c0_28 = arith.constant 0 : index
      %c0_29 = arith.constant 0 : index
      %47 = vector.load %arg5[%c0_26, %c0_27, %c0_28, %c0_29] : memref<1x1x4x1xf32, #tpu.memory_space<vmem>>, vector<1x1x4x1xf32>
      %48 = vector.shape_cast %47 : vector<1x1x4x1xf32> to vector<4x1xf32>
      %49 = vector.shape_cast %46 : vector<4x1xf32> to vector<1x1x4x1xf32>
      tpu.vector_store %arg5[%c0_26, %c0_27, %c0_28, %c0_29], %49 {strides = array<i32>} : memref<1x1x4x1xf32, #tpu.memory_space<vmem>>, vector<1x1x4x1xf32>,
      %cst_30 = arith.constant 0.000000e+00 : f32
      %50 = vector.broadcast %cst_30 : f32 to vector<4x1xf32>
      %c0_31 = arith.constant 0 : index
      %c0_32 = arith.constant 0 : index
      %c0_33 = arith.constant 0 : index
      %c0_34 = arith.constant 0 : index
      %51 = vector.load %arg6[%c0_31, %c0_32, %c0_33, %c0_34] : memref<1x1x4x1xf32, #tpu.memory_space<vmem>>, vector<1x1x4x1xf32>
      %52 = vector.shape_cast %51 : vector<1x1x4x1xf32> to vector<4x1xf32>
      %53 = vector.shape_cast %50 : vector<4x1xf32> to vector<1x1x4x1xf32>
      tpu.vector_store %arg6[%c0_31, %c0_32, %c0_33, %c0_34], %53 {strides = array<i32>} : memref<1x1x4x1xf32, #tpu.memory_space<vmem>>, vector<1x1x4x1xf32>,
    } else {
    }
    %c0 = arith.constant 0 : index
    %c0_1 = arith.constant 0 : index
    %c0_2 = arith.constant 0 : index
    %3 = vector.load %arg3[%c0, %c0_1, %c0_2] : memref<1x4x256xf32, #tpu.memory_space<vmem>>, vector<1x4x256xf32>
    %4 = vector.shape_cast %3 : vector<1x4x256xf32> to vector<4x256xf32>
    %c0_3 = arith.constant 0 : index
    %c0_4 = arith.constant 0 : index
    %c0_5 = arith.constant 0 : index
    %5 = vector.load %arg4[%c0_3, %c0_4, %c0_5] : memref<1x1x256xi32, #tpu.memory_space<vmem>>, vector<1x1x256xi32>
    %6 = vector.shape_cast %5 : vector<1x1x256xi32> to vector<1x256xi32>
    %7 = tpu.iota {dimensions = array<i32: 0>} : vector<4x1xi32>
    %8 = vector.broadcast %6 : vector<1x256xi32> to vector<4x256xi32>
    %9 = vector.broadcast %7 : vector<4x1xi32> to vector<4x256xi32>
    %10 = arith.cmpi eq, %8, %9 : vector<4x256xi32>
    %11 = arith.extui %10 : vector<4x256xi1> to vector<4x256xi32>
    %12 = arith.sitofp %11 : vector<4x256xi32> to vector<4x256xf32>
    %cst = arith.constant dense<0xFF800000> : vector<256xf32>
    %13 = vector.multi_reduction <maximumf>, %4, %cst [0] : vector<4x256xf32> to vector<256xf32>
    %14 = vector.shape_cast %13 : vector<256xf32> to vector<1x256xf32>
    %15 = vector.broadcast %14 : vector<1x256xf32> to vector<4x256xf32>
    %16 = arith.cmpf oeq, %4, %15 : vector<4x256xf32>
    %c4_i32 = arith.constant 4 : i32
    %17 = vector.shape_cast %7 : vector<4x1xi32> to vector<4x1xi32>
    %18 = vector.broadcast %17 : vector<4x1xi32> to vector<4x256xi32>
    %19 = vector.broadcast %c4_i32 : i32 to vector<4x256xi32>
    %20 = arith.select %16, %18, %19 : vector<4x256xi1>, vector<4x256xi32>
    %cst_6 = arith.constant dense<2147483647> : vector<256xi32>
    %21 = vector.multi_reduction <minsi>, %20, %cst_6 [0] : vector<4x256xi32> to vector<256xi32>
    %22 = vector.shape_cast %21 : vector<256xi32> to vector<1x256xi32>
    %23 = vector.broadcast %22 : vector<1x256xi32> to vector<4x256xi32>
    %24 = vector.broadcast %7 : vector<4x1xi32> to vector<4x256xi32>
    %25 = arith.cmpi eq, %23, %24 : vector<4x256xi32>
    %26 = arith.extui %25 : vector<4x256xi1> to vector<4x256xi32>
    %27 = arith.sitofp %26 : vector<4x256xi32> to vector<4x256xf32>
    %c0_7 = arith.constant 0 : index
    %c0_8 = arith.constant 0 : index
    %c0_9 = arith.constant 0 : index
    %c0_10 = arith.constant 0 : index
    %28 = vector.load %arg5[%c0_7, %c0_8, %c0_9, %c0_10] : memref<1x1x4x1xf32, #tpu.memory_space<vmem>>, vector<1x1x4x1xf32>
    %29 = vector.shape_cast %28 : vector<1x1x4x1xf32> to vector<4x1xf32>
    %30 = arith.mulf %27, %12 : vector<4x256xf32>
    %cst_11 = arith.constant dense<0.000000e+00> : vector<4xf32>
    %31 = vector.multi_reduction <add>, %30, %cst_11 [1] : vector<4x256xf32> to vector<4xf32>
    %32 = vector.shape_cast %31 : vector<4xf32> to vector<4x1xf32>
    %33 = arith.addf %29, %32 : vector<4x1xf32>
    %c0_12 = arith.constant 0 : index
    %c0_13 = arith.constant 0 : index
    %c0_14 = arith.constant 0 : index
    %c0_15 = arith.constant 0 : index
    %34 = vector.load %arg5[%c0_12, %c0_13, %c0_14, %c0_15] : memref<1x1x4x1xf32, #tpu.memory_space<vmem>>, vector<1x1x4x1xf32>
    %35 = vector.shape_cast %34 : vector<1x1x4x1xf32> to vector<4x1xf32>
    %36 = vector.shape_cast %33 : vector<4x1xf32> to vector<1x1x4x1xf32>
    tpu.vector_store %arg5[%c0_12, %c0_13, %c0_14, %c0_15], %36 {strides = array<i32>} : memref<1x1x4x1xf32, #tpu.memory_space<vmem>>, vector<1x1x4x1xf32>,
    %c0_16 = arith.constant 0 : index
    %c0_17 = arith.constant 0 : index
    %c0_18 = arith.constant 0 : index
    %c0_19 = arith.constant 0 : index
    %37 = vector.load %arg6[%c0_16, %c0_17, %c0_18, %c0_19] : memref<1x1x4x1xf32, #tpu.memory_space<vmem>>, vector<1x1x4x1xf32>
    %38 = vector.shape_cast %37 : vector<1x1x4x1xf32> to vector<4x1xf32>
    %39 = arith.addf %27, %12 : vector<4x256xf32>
    %cst_20 = arith.constant dense<0.000000e+00> : vector<4xf32>
    %40 = vector.multi_reduction <add>, %39, %cst_20 [1] : vector<4x256xf32> to vector<4xf32>
    %41 = vector.shape_cast %40 : vector<4xf32> to vector<4x1xf32>
    %42 = arith.addf %38, %41 : vector<4x1xf32>
    %c0_21 = arith.constant 0 : index
    %c0_22 = arith.constant 0 : index
    %c0_23 = arith.constant 0 : index
    %c0_24 = arith.constant 0 : index
    %43 = vector.load %arg6[%c0_21, %c0_22, %c0_23, %c0_24] : memref<1x1x4x1xf32, #tpu.memory_space<vmem>>, vector<1x1x4x1xf32>
    %44 = vector.shape_cast %43 : vector<1x1x4x1xf32> to vector<4x1xf32>
    %45 = vector.shape_cast %42 : vector<4x1xf32> to vector<1x1x4x1xf32>
    tpu.vector_store %arg6[%c0_21, %c0_22, %c0_23, %c0_24], %45 {strides = array<i32>} : memref<1x1x4x1xf32, #tpu.memory_space<vmem>>, vector<1x1x4x1xf32>,
    return
  }
  func.func @transform_0(%arg0: i32, %arg1: i32, %arg2: i32) -> (i32, i32, i32) {
    %c1_i32 = arith.constant 1 : i32
    %0 = arith.muli %arg1, %c1_i32 : i32
    %1 = arith.addi %0, %arg2 : i32
    %c0_i32 = arith.constant 0 : i32
    %c0_i32_0 = arith.constant 0 : i32
    return %arg0, %c0_i32, %1 : i32, i32, i32
  }
  func.func @transform_1(%arg0: i32, %arg1: i32, %arg2: i32) -> (i32, i32, i32) {
    %c1_i32 = arith.constant 1 : i32
    %0 = arith.muli %arg1, %c1_i32 : i32
    %1 = arith.addi %0, %arg2 : i32
    %c0_i32 = arith.constant 0 : i32
    %c0_i32_0 = arith.constant 0 : i32
    return %arg0, %c0_i32, %1 : i32, i32, i32
  }
  func.func @transform_2(%arg0: i32, %arg1: i32, %arg2: i32) -> (i32, i32, i32, i32) {
    %c0_i32 = arith.constant 0 : i32
    %c0_i32_0 = arith.constant 0 : i32
    %c0_i32_1 = arith.constant 0 : i32
    return %arg0, %arg1, %c0_i32, %c0_i32_0 : i32, i32, i32, i32
  }
  func.func @transform_3(%arg0: i32, %arg1: i32, %arg2: i32) -> (i32, i32, i32, i32) {
    %c0_i32 = arith.constant 0 : i32
    %c0_i32_0 = arith.constant 0 : i32
    %c0_i32_1 = arith.constant 0 : i32
    return %arg0, %arg1, %c0_i32, %c0_i32_0 : i32, i32, i32, i32
  }
}

</mosaic_0001>

<bundles_post_ra>
// kernel: tpu_custom_call.1
= control target key start
LH: loop header
LB: loop body
LE: loop exit
PB: predicated region body
PF: predicated region fallthrough
CT: control target
= control target key end

     0   :  { %9 = vsyncpa [#allocation3], 0  ;;  %s979_s0 = inlined_call_operand.hbm [shape: f32[2,4,256], index: 0, kind: input, shape index: {}]   ;;  %s980_s1 = inlined_call_operand.hbm [shape: s32[2,1,256], index: 1, kind: input, shape index: {}]   ;;  %s981_s2 = inlined_call_operand.vmem [shape: f32[2,1,4,1], index: 2, kind: output, shape index: {0}]   ;;  %s982_s3 = inlined_call_operand.vmem [shape: f32[2,1,4,1], index: 3, kind: output, shape index: {1}]  }
   0x1   :  { %11 = vsyncpa [#allocation3 + $0x1], 0 }
   0x2   :  { %12 = vsyncpa [#allocation5], 0 }
   0x3   :  { %14 = vsyncpa [#allocation5 + $0x1], 0  ;;  %s777_s12 = smov 0   ;;  %s779_s13 = smov 0  }
   0x4   :  { %s781_s14 = smov 0   ;;  %s783_s15 = smov 0  }
   0x5   :  { %s785_s16 = smov 0   ;;  %s787_s17 = smov 0  }
   0x6 LB: > { %s551_s18 = sadd.s32 4294967295, %s751_s17   ;;  %s39_s19 = sadd.s32 1, %s747_s16  ;;  %s751_s17 = sphi %s787_s17, %s20_s17   ;;  %s747_s16 = sphi %s785_s16, %s996_s16   ;;  %s743_s15 = sphi %s783_s15, %s995_s15   ;;  %s739_s14 = sphi %s781_s14, %s994_s14   ;;  %s735_s13 = sphi %s779_s13, %s993_s13   ;;  %s731_s12 = sphi %s777_s12, %s992_s12  }
   0x7   : > { %p41_p0 = scmp.ge.s32.totalorder %s39_s19, 2  ;;  %s50_s20 = sadd.s32 1, %s739_s14 }
   0x8   : > { %p57_p1 = scmp.ne.s32.totalorder %s739_s14, %s735_s13  ;;  %p58_p2 = scmp.eq.s32.totalorder %s751_s17, 0 }
   0x9   : > { %s998_s19 = smov (%p41_p0, %s39_s19), 0  ;;  %p63_p4 = scmp.ne.s32.totalorder %s735_s13, %s731_s12 }
   0xa   : > { %p813_p3 = por %p58_p2, %p57_p1  ;;  %s45_s22 = ssub.s32 %s747_s16, %s998_s19 }
   0xb   : > { %p64_p5 = scmp.eq.s32.totalorder %s551_s18, 0  ;;  %p48_p6 = scmp.eq.s32.totalorder %s45_s22, 0 }
   0xc   : > { %p585_p8 = scmp.lt.s32.totalorder %s751_s17, 2  ;;  %s829_s25 = sand.u32 1, %s739_s14  }
   0xd   : > { %p820_p7 = por %p64_p5, %p63_p4  ;;  %s572_s26 = sshll.u32 %s747_s16, 7 }
   0xe   : > { %s826_s24 = scalar_select %p48_p6, %s739_s14, %s50_s20  }
   0xf   : > { %s985_s23 = scalar_select %p820_p7, 1, 0 }
  0x10   : > { %s555_s27 = sshll.u32 %s829_s25, 3  ;;  %s836_s30 = scalar_lea.hbm %s979_s0, %s572_s26 }
  0x11   : > { %s177_s4 = scalar_lea.vmem [#allocation2], %s555_s27  ;;  %p840_p9 = pnand %p585_p8, %p813_p3 }
  0x12   : > { %s188_s5 = sshll.u32 %s177_s4, 4  ;;  %s174_s7 = scalar_lea.sflag [#allocation3], %s829_s25  ;;  %s844_s5 = int_to_ptr.vmem [resolvable:$true] %s188_s5 }
  0x13   : > { %s637_s8 = scalar_lea.hbm %s836_s30, 128  ;;  %p639_p13 = pneg %p840_p9 }
  0x14   : > { %p638_p12 = scmp.ne.s32.totalorder %s836_s30, %s637_s8  ;;  %s642_s11 = scalar_lea.hbm %s979_s0, 256 }
  0x15   : > { %p643_p2 = scmp.lt.u32.totalorder %s836_s30, %s979_s0  ;;  %p644_p3 = scmp.lt.u32.totalorder %s642_s11, %s637_s8 }
  0x16   : > { %p640_p0 = pnand %p639_p13, %p638_p12  ;;  %p646_p5 = scmp.lt.u32.totalorder %s637_s8, %s836_s30 }
  0x17   : > { %p645_p4 = por %p644_p3, %p643_p2 }
  0x18   : > { %p641_p1 = pneg %p640_p0 }
  0x19   : > { %p647_p6 = por %p646_p5, %p645_p4 }
  0x1b   : > { %p648_p8 = pnand %p647_p6, %p641_p1 }
  0x1d   : > { %651 = shalt.err (!%p648_p8)
}
  0x1e   : > { %s652_s20 = scalar_lea.vmem %s844_s5, 128  ;;  %s753_s21 = smov [#allocation2]  }
  0x1f   : > { %p653_p12 = scmp.ne.s32.totalorder %s844_s5, %s652_s20  ;;  %s657_s22 = sshll.u32 %s753_s21, 4  ;;  %s658_s22 = int_to_ptr.vmem [resolvable:$false] %s657_s22 }
  0x20   : > { %s659_s26 = scalar_lea.vmem %s658_s22, 256  ;;  %p660_p11 = scmp.lt.s32.totalorder %s844_s5, %s658_s22 }
  0x21   : > { %p655_p0 = pnand %p653_p12, %p639_p13  ;;  %p661_p2 = scmp.lt.s32.totalorder %s659_s26, %s652_s20 }
  0x23   : > { %p656_p10 = pneg %p655_p0  ;;  %p662_p3 = por %p661_p2, %p660_p11 }
  0x25   : > { %p663_p4 = pnand %p662_p3, %p656_p10 }
  0x27   : > { %666 = shalt.err (!%p663_p4)
}
  0x28   : > { %581 = dma.hbm_to_vmem [thread:$0]  (!%p840_p9), %s836_s30, 128, %s844_s5, %s174_s7  }
  0x29   : > { %p987_p1 = scmp.lt.s32.totalorder %s751_s17, 3  ;;  %p988_p5 = scmp.ge.s32.totalorder %s751_s17, 1 }
  0x2a   : > { %s558_s28 = sshll.u32 %s829_s25, 1  ;;  %s573_s29 = sshll.u32 %s747_s16, 5 }
  0x2b   : > { %p878_p6 = pnand %p988_p5, %p987_p1  ;;  %s887_s9 = scalar_lea.hbm %s980_s1, %s573_s29 }
  0x2c   : > { %s199_s10 = scalar_lea.vmem [#allocation4], %s558_s28  ;;  %s196_s30 = scalar_lea.sflag [#allocation5], %s829_s25 }
  0x2d   : > { %s989_s27 = scalar_select %p878_p6, 1, 0 }
  0x2e   : > { %s210_s11 = sshll.u32 %s199_s10, 4  ;;  %s667_s5 = scalar_lea.hbm %s887_s9, 32  ;;  %s211_s11 = int_to_ptr.vmem [resolvable:$true] %s210_s11 }
  0x2f   : > { %p668_p10 = scmp.ne.s32.totalorder %s887_s9, %s667_s5  ;;  %s672_s18 = scalar_lea.hbm %s980_s1, 64 }
  0x30   : > { %p673_p12 = scmp.lt.u32.totalorder %s887_s9, %s980_s1  ;;  %p674_p0 = scmp.lt.u32.totalorder %s672_s18, %s667_s5 }
  0x31   : > { %p670_p11 = pnand %p668_p10, %p639_p13  ;;  %p676_p3 = scmp.lt.u32.totalorder %s667_s5, %s887_s9 }
  0x32   : > { %p675_p2 = por %p674_p0, %p673_p12 }
  0x33   : > { %p671_p8 = pneg %p670_p11 }
  0x34   : > { %p677_p4 = por %p676_p3, %p675_p2 }
  0x36   : > { %p678_p1 = pnand %p677_p4, %p671_p8 }
  0x38   : > { %681 = shalt.err (!%p678_p1)
}
  0x39   : > { %s682_s25 = scalar_lea.vmem %s211_s11, 32  ;;  %s754_s22 = smov [#allocation4]  }
  0x3a   : > { %p683_p5 = scmp.ne.s32.totalorder %s211_s11, %s682_s25  ;;  %s687_s26 = sshll.u32 %s754_s22, 4  ;;  %s688_s26 = int_to_ptr.vmem [resolvable:$false] %s687_s26 }
  0x3b   : > { %s689_s28 = scalar_lea.vmem %s688_s26, 64  ;;  %p690_p7 = scmp.lt.s32.totalorder %s211_s11, %s688_s26 }
  0x3c   : > { %p685_p10 = pnand %p683_p5, %p639_p13  ;;  %p691_p6 = scmp.lt.s32.totalorder %s689_s28, %s682_s25 }
  0x3e   : > { %p686_p11 = pneg %p685_p10  ;;  %p692_p0 = por %p691_p6, %p690_p7 }
  0x40   : > { %p693_p12 = pnand %p692_p0, %p686_p11 }
  0x42   : > { %696 = shalt.err (!%p693_p12)
}
  0x43   : > { %584 = dma.hbm_to_vmem [thread:$0]  (!%p840_p9), %s887_s9, 32, %s211_s11, %s196_s30  }
  0x44   : > { %p990_p8 = scmp.ne.s32.totalorder %s989_s27, 0 }
  0x45   : > { %s221_s29 = sand.u32 (!%p990_p8), 1, %s735_s13   ;;  %p991_p13 = scmp.ne.s32.totalorder (!%p990_p8), %s985_s23, 0 }
  0x46   : > { %219 = sbr.rel (%p990_p8) target bundleno = 272 (0x110), region = 28  ;;  %s562_s4 = sshll.u32 (!%p990_p8), %s221_s29, 3 }
  0x47   : > { %s222_s8 = scalar_lea.sflag (!%p990_p8), [#allocation3], %s221_s29  ;;  %s225_s10 = scalar_lea.vmem (!%p990_p8), [#allocation2], %s562_s4 }
  0x4d   : > { %722 = dma.done.wait (%p991_p13), %s222_s8, 128  }
  0x4e   : > { %724 = vsyncadd (%p991_p13), %s222_s8, 4294967168  ;;  %s563_s5 = sshll.u32 %s221_s29, 1  ;;  %s231_s7 = scalar_lea.sflag [#allocation5], %s221_s29 }
  0x4f   : > { %s916_s6 = scalar_lea.vmem [#allocation4], %s563_s5 }
  0x50   : > { %726 = dma.done.wait (%p991_p13), %s231_s7, 32  }
  0x51   : > { %728 = vsyncadd (%p991_p13), %s231_s7, 4294967264  ;;  %p275_p7 = scmp.lt.s32.totalorder %s743_s15, 1  ;;  %vm293_vm0 = vcmask 3072   ;;  %vm317_vm1 = vcmask 1043456   ;;  %v755_v0 = vmov 0.0   ;;  %v296_v1 = vld [vmem:[%s225_s10] sm:$0xff]  ;;  %v298_v5 = vlaneseq }
  0x52   : > { %v315_v2 = vcombine.high %v296_v1, %v296_v1  ;;  %v318_v3 = vsel %vm317_vm1, %v296_v1, -inf  ;;  %v756_v7 = vmov 839922192   ;;  %v297_v30 = vld [vmem:[%s916_s6] sm:$0x3] }
  0x53   : > { %s1000_s15 = smov (!%p275_p7, %s743_s15), 1  ;;  %v319_v4 = vrot.slane %v318_v3, 4  ;;  %v338_v8 = vunpack.c.l.s4 %v756_v7  ;;  %v299_v13 = vshrl.u32 %v298_v5, 7 }
  0x54   : > { %s564_s27 = sshll.u32 %s1000_s15, 2  ;;  %v325_v6 = vsel %vm317_vm1, %v315_v2, -inf }
  0x55   : > { %s932_s30 = scalar_lea.vmem %s981_s2, %s564_s27  ;;  %v320_v9 = vmax.f32 %v318_v3, %v319_v4  ;;  %v326_v10 = vrot.slane %v325_v6, 4  ;;  %v339_v14 = vunpack.c.0.s8 %v338_v8  ;;  %v302_v28 = vsub.s32 0, %v299_v13  ;;  %s288_s18 = scalar_lea.vmem %s982_s3, %s564_s27 }
  0x56   : > { %294 = vst.msk [vmem:[%s932_s30] sm:$0xf] %vm293_vm0, %v755_v0  ;;  %v306_v32 = vsub.s32 1, %v299_v13  ;;  %295 = vst.msk [vmem:[%s288_s18] sm:$0xf] %vm293_vm0, %v755_v0 }
  0x57   : > { %v321_v11 = vrot.slane %v320_v9, 2  ;;  %v327_v12 = vmax.f32 %v325_v6, %v326_v10  ;;  %v342_v19 = vsub.s32 %v339_v14, %v299_v13  ;;  %v303_v35 = vrot.slane %v297_v30, %v302_v28 }
  0x58   : > { %v307_v38 = vrot.slane %v297_v30, %v306_v32 }
  0x59   : > { %v322_v15 = vmax.f32 %v320_v9, %v321_v11  ;;  %v328_v16 = vrot.slane %v327_v12, 2  ;;  %v343_v23 = vrot.slane %v299_v13, %v342_v19  ;;  %vm308_vm6 = vcmp.eq.s32.totalorder %v303_v35, %v299_v13 }
  0x5a   : > { %vm309_vm8 = vcmp.eq.s32.totalorder %v307_v38, %v299_v13  ;;  %v566_v44 = vsel %vm308_vm6, 1.0, %v755_v0 }
  0x5b   : > { %v323_v17 = vrot.slane %v322_v15, 1  ;;  %v329_v18 = vmax.f32 %v327_v12, %v328_v16  ;;  %v567_v46 = vsel %vm309_vm8, 1.0, %v755_v0 }
  0x5d   : > { %v324_v20 = vmax.f32 %v322_v15, %v323_v17  ;;  %v330_v21 = vrot.slane %v329_v18, 1  ;;  %v372_v60 = vld [vmem:[%s932_s30] sm:$0xf] }
  0x5e   : > { %v383_v63 = vld [vmem:[%s288_s18] sm:$0xf] }
  0x5f   : > { %v331_v22 = vmax.f32 %v329_v18, %v330_v21 }
  0x61   : > { %v334_v24 = vcombine.low %v324_v20, %v331_v22 }
  0x63   : > { %vm336_vm2 = vcmp.eq.f32.partialorder %v296_v1, %v334_v24 }
  0x64   : > { %v344_v25 = vsel %vm336_vm2, %v343_v23, 4 }
  0x65   : > { %v345_v26 = vcombine.high %v344_v25, %v344_v25  ;;  %v346_v27 = vsel %vm317_vm1, %v344_v25, 2147483647 }
  0x66   : > { %v347_v29 = vrot.slane %v346_v27, 4 }
  0x67   : > { %v356_v31 = vsel %vm317_vm1, %v345_v26, 2147483647 }
  0x68   : > { %vm348_vm3 = vcmp.lt.s32.totalorder %v346_v27, %v347_v29  ;;  %v357_v33 = vrot.slane %v356_v31, 4 }
  0x69   : > { %v349_v34 = vsel %vm348_vm3, %v346_v27, %v347_v29 }
  0x6a   : > { %v350_v36 = vrot.slane %v349_v34, 2  ;;  %vm358_vm4 = vcmp.lt.s32.totalorder %v356_v31, %v357_v33 }
  0x6b   : > { %v359_v37 = vsel %vm358_vm4, %v356_v31, %v357_v33 }
  0x6c   : > { %vm351_vm5 = vcmp.lt.s32.totalorder %v349_v34, %v350_v36  ;;  %v360_v39 = vrot.slane %v359_v37, 2 }
  0x6d   : > { %v352_v40 = vsel %vm351_vm5, %v349_v34, %v350_v36 }
  0x6e   : > { %v353_v41 = vrot.slane %v352_v40, 1  ;;  %vm361_vm7 = vcmp.lt.s32.totalorder %v359_v37, %v360_v39 }
  0x6f   : > { %v362_v42 = vsel %vm361_vm7, %v359_v37, %v360_v39 }
  0x70   : > { %vm354_vm9 = vcmp.lt.s32.totalorder %v352_v40, %v353_v41  ;;  %v363_v43 = vrot.slane %v362_v42, 1 }
  0x71   : > { %v355_v45 = vsel %vm354_vm9, %v352_v40, %v353_v41 }
  0x72   : > { %vm364_vm10 = vcmp.lt.s32.totalorder %v362_v42, %v363_v43  ;;  %vm366_vm11 = vcmp.eq.s32.totalorder %v355_v45, %v299_v13 }
  0x73   : > { %v365_v47 = vsel %vm364_vm10, %v362_v42, %v363_v43  ;;  %v568_v48 = vsel %vm366_vm11, 1.0, %v755_v0 }
  0x74   : > { %vm367_vm12 = vcmp.eq.s32.totalorder %v365_v47, %v299_v13  ;;  %v373_v49 = vmul.f32 %v568_v48, %v566_v44  ;;  %v384_v50 = vadd.f32 %v568_v48, %v566_v44 }
  0x75   : > { %v569_v51 = vsel %vm367_vm12, 1.0, %v755_v0 }
  0x76   : > { %v374_v52 = vmul.f32 %v569_v51, %v567_v46  ;;  %v375_v53 = vsel %vm317_vm1, %v373_v49, 0.0  ;;  %v385_v54 = vadd.f32 %v569_v51, %v567_v46  ;;  %v386_v56 = vsel %vm317_vm1, %v384_v50, 0.0 }
  0x78   : > { %v376_v55 = vsel %vm317_vm1, %v374_v52, 0.0  ;;  %v387_v57 = vsel %vm317_vm1, %v385_v54, 0.0 }
  0x79   : > { %v377_v58 = vadd.f32 %v376_v55, %v375_v53  ;;  %v388_v59 = vadd.f32 %v387_v57, %v386_v56 }
  0x7b   : > { %378 = vadd.xlane.f32.xlu0 %v377_v58 }
  0x7f   : > { %389 = vadd.xlane.f32.xlu0 %v388_v59 }
 0x108   : > { %v379_v61 = vpop.xlane.xlu0 %378 }
 0x109   : > { %v380_v62 = vadd.f32 %v379_v61, %v372_v60 }
 0x10b   : > { %382 = vst.msk [vmem:[%s932_s30] sm:$0xf] %vm293_vm0, %v380_v62 }
 0x10c   : > { %v390_v1 = vpop.xlane.xlu0 %389 }
 0x10d   : > { %v391_v2 = vadd.f32 %v390_v1, %v383_v63 }
 0x10f   : > { %392 = vst.msk [vmem:[%s288_s18] sm:$0xf] %vm293_vm0, %v391_v2 }
 0x110 PF: > { %s20_s17 = sadd.s32 1, %s751_s17   ;;  %s992_s12 = smov %s735_s13 }
 0x111   : > { %p17_p9 = scmp.ge.s32.totalorder %s20_s17, 4   ;;  %s993_s13 = smov %s739_s14 }
 0x112   : > { %s994_s14 = smov %s826_s24  ;;  %s995_s15 = smov %s747_s16 }
 0x113   : > { %s996_s16 = smov %s998_s19  ;;  %19 = sbr.rel (!%p17_p9) target bundleno = 6 (0x6), region = 97 }
 0x11a   :  { %438 = vsyncpa [#allocation3], 1 }
 0x11b   :  { %440 = vsyncpa [#allocation3 + $0x1], 1 }
 0x11c   :  { %441 = vsyncpa [#allocation5], 1 }
 0x11d   :  { %443 = vsyncpa [#allocation5 + $0x1], 1 }

</bundles_post_ra>
